<compile_context>
chip_gen: v7x
topology: tpu7x:2x2x1
jax: 0.10.0
libtpu: 0.0.40
codegen_flags: <defaults>
</compile_context>

<pallas_src>
import functools
import math

import jax
import jax.numpy as jnp
from jax.experimental import pallas as pl
from jax.experimental.pallas import tpu as pltpu


# ----------------------------------------------------------------------------
# Parameter setup (deterministic): sinusoidal positional-encoding buffer.
# ----------------------------------------------------------------------------
def make_pe_buffer(h: int, max_len: int = 64, dtype=jnp.float32) -> jnp.ndarray:
    position = jnp.arange(max_len, dtype=jnp.float32)[:, None]             # (L, 1)
    div_term = jnp.exp(
        jnp.arange(0, h, 2, dtype=jnp.float32) * (-math.log(10000.0) / h)  # (H/2,)
    )
    pe = jnp.zeros((max_len, h), dtype=jnp.float32)
    pe = pe.at[:, 0::2].set(jnp.sin(position * div_term))
    pe = pe.at[:, 1::2].set(jnp.cos(position * div_term))
    return pe[None].astype(dtype)                                          # (1, L, H)


# ----------------------------------------------------------------------------
# Kernels (operate on lane-dense 2-D views: x (B, S*H), pe (1, S*H))
# ----------------------------------------------------------------------------
def pe_add_kernel(x_ref, pe_ref, o_ref):
    # eval-mode forward: x + pe  (dropout is identity)
    y = x_ref[...].astype(jnp.float32) + pe_ref[...]
    o_ref[...] = y.astype(o_ref.dtype)


def pe_add_dropout_kernel(x_ref, pe_ref, u_ref, o_ref, *, p):
    # training-mode forward: dropout(x + pe), keep-prob (1-p), scale 1/(1-p)
    y = x_ref[...].astype(jnp.float32) + pe_ref[...]
    scale = jnp.float32(1.0 / (1.0 - p))
    keep = u_ref[...] >= jnp.float32(p)          # P(keep) = 1 - p
    o_ref[...] = jnp.where(keep, y * scale, jnp.float32(0.0)).astype(o_ref.dtype)


# ----------------------------------------------------------------------------
# Wrapper
# ----------------------------------------------------------------------------
def _choose_blocks(rows: int, cols: int):
    # Lane (last) dim: multiple of 128 if possible, else the full extent.
    if cols % 128 == 0:
        col_block = min(cols, 2048)
    else:
        col_block = cols
    # Sublane (second-to-last) dim: full extent if small, else multiple of 8.
    if rows <= 8:
        row_block = rows
    else:
        row_block = min(rows, 256)
        row_block -= row_block % 8
    return row_block, col_block


def positional_encoding_forward(x, pe_buffer, *, p=0.1, training=False, rng_key=None):
    """x: (B, S, H); pe_buffer: (1, max_len, H) with max_len >= S."""
    B, S, H = x.shape
    N = S * H

    # Lane-dense 2-D views: last axis S*H (a multiple of 128 for typical H).
    x2 = x.reshape(B, N)
    pe2 = pe_buffer[0, :S, :].reshape(1, N).astype(jnp.float32)  # (1, S*H)

    row_block, col_block = _choose_blocks(B, N)
    # Grid: columns outer ("parallel", shards across v7x TCs), batch inner
    # ("arbitrary") so the PE block index is unchanged across the inner loop
    # and the PE tile stays resident in VMEM.
    grid = (pl.cdiv(N, col_block), pl.cdiv(B, row_block))

    x_spec = pl.BlockSpec((row_block, col_block), lambda c, b: (b, c))
    pe_spec = pl.BlockSpec((1, col_block), lambda c, b: (0, c))   # ignores batch axis
    out_spec = pl.BlockSpec((row_block, col_block), lambda c, b: (b, c))

    cparams = pltpu.CompilerParams(
        dimension_semantics=("parallel", "arbitrary"),
        vmem_limit_bytes=32 * 1024 * 1024,
    )

    if not training:
        y2 = pl.pallas_call(
            pe_add_kernel,
            out_shape=jax.ShapeDtypeStruct((B, N), x.dtype),
            grid=grid,
            in_specs=[x_spec, pe_spec],
            out_specs=out_spec,
            compiler_params=cparams,
        )(x2, pe2)
        return y2.reshape(B, S, H)

    if rng_key is None:
        rng_key = jax.random.PRNGKey(0)
    # TODO(synk): dropout mask cannot bit-match torch's RNG stream; uniforms are
    # drawn host-side with jax.random (in-kernel TPU PRNG is not lowerable in
    # interpret mode) -- statistical semantics (keep-prob 1-p, scale 1/(1-p)) hold.
    u = jax.random.uniform(rng_key, (B, N), dtype=jnp.float32)
    u_spec = pl.BlockSpec((row_block, col_block), lambda c, b: (b, c))

    y2 = pl.pallas_call(
        functools.partial(pe_add_dropout_kernel, p=p),
        out_shape=jax.ShapeDtypeStruct((B, N), x.dtype),
        grid=grid,
        in_specs=[x_spec, pe_spec, u_spec],
        out_specs=out_spec,
        compiler_params=cparams,
    )(x2, pe2, u)
    return y2.reshape(B, S, H)


# ----------------------------------------------------------------------------
# Main
# ----------------------------------------------------------------------------
if __name__ == "__main__":
    B, S, H, MAX_LEN = 2, 8, 32, 64
    P_DROP = 0.1

    key = jax.random.PRNGKey(0)
    k_x, k_drop = jax.random.split(key)
    x = jax.random.normal(k_x, (B, S, H), dtype=jnp.float32)

    pe_buffer = make_pe_buffer(H, max_len=MAX_LEN, dtype=jnp.float32)
    y_ref = x + pe_buffer[:, :S, :]

    # Eval-mode forward (dropout identity) -- check against pure-JAX reference.
    y_eval = positional_encoding_forward(x, pe_buffer, p=P_DROP, training=False)
    y_eval = jax.block_until_ready(y_eval)
    assert y_eval.shape == (B, S, H)
    assert jnp.allclose(y_eval, y_ref, atol=1e-6, rtol=1e-6), "eval-mode mismatch"

    # Training-mode forward (dropout active).
    y_train = positional_encoding_forward(
        x, pe_buffer, p=P_DROP, training=True, rng_key=k_drop
    )
    y_train = jax.block_until_ready(y_train)
    assert y_train.shape == (B, S, H)
    # Every element is either dropped (0) or (x+pe)/(1-p).
    scaled_ref = y_ref / (1.0 - P_DROP)
    ok = jnp.isclose(y_train, 0.0, atol=1e-6) | jnp.isclose(
        y_train, scaled_ref, atol=1e-5, rtol=1e-5
    )
    assert bool(jnp.all(ok)), "training-mode dropout semantics mismatch"

    print("KERNEL_OK")
</pallas_src>

<mosaic_0001>
module attributes {stable_mosaic.version = 11 : i64} {
  func.func @pe_add_kernel(%arg0: i32, %arg1: i32, %arg2: memref<2x256xf32, #tpu.memory_space<vmem>>, %arg3: memref<1x256xf32, #tpu.memory_space<vmem>>, %arg4: memref<2x256xf32, #tpu.memory_space<vmem>>) attributes {dimension_semantics = [#tpu.dimension_semantics<parallel>, #tpu.dimension_semantics<arbitrary>], iteration_bounds = array<i64: 1, 1>, scalar_prefetch = 0 : i64, scratch_operands = 0 : i64, tpu.core_type = #tpu.core_type<tc>, window_params = [{transform_indices = @transform_0, window_bounds = array<i64: 2, 256>}, {transform_indices = @transform_1, window_bounds = array<i64: 1, 256>}, {transform_indices = @transform_2, window_bounds = array<i64: 2, 256>}]} {
    %c0 = arith.constant 0 : index
    %c0_0 = arith.constant 0 : index
    %0 = vector.load %arg2[%c0, %c0_0] : memref<2x256xf32, #tpu.memory_space<vmem>>, vector<2x256xf32>
    %c0_1 = arith.constant 0 : index
    %c0_2 = arith.constant 0 : index
    %1 = vector.load %arg3[%c0_1, %c0_2] : memref<1x256xf32, #tpu.memory_space<vmem>>, vector<1x256xf32>
    %2 = vector.broadcast %1 : vector<1x256xf32> to vector<2x256xf32>
    %3 = arith.addf %0, %2 : vector<2x256xf32>
    %c0_3 = arith.constant 0 : index
    %c0_4 = arith.constant 0 : index
    %4 = vector.load %arg4[%c0_3, %c0_4] : memref<2x256xf32, #tpu.memory_space<vmem>>, vector<2x256xf32>
    tpu.vector_store %arg4[%c0_3, %c0_4], %3 {strides = array<i32>} : memref<2x256xf32, #tpu.memory_space<vmem>>, vector<2x256xf32>,
    return
  }
  func.func @transform_0(%arg0: i32, %arg1: i32) -> (i32, i32) {
    %c0_i32 = arith.constant 0 : i32
    return %arg1, %arg0 : i32, i32
  }
  func.func @transform_1(%arg0: i32, %arg1: i32) -> (i32, i32) {
    %c0_i32 = arith.constant 0 : i32
    %c0_i32_0 = arith.constant 0 : i32
    return %c0_i32, %arg0 : i32, i32
  }
  func.func @transform_2(%arg0: i32, %arg1: i32) -> (i32, i32) {
    %c0_i32 = arith.constant 0 : i32
    return %arg1, %arg0 : i32, i32
  }
}

</mosaic_0001>

<bundles_post_ra>
// kernel: tpu_custom_call.1
= control target key start
LH: loop header
LB: loop body
LE: loop exit
PB: predicated region body
PF: predicated region fallthrough
CT: control target
= control target key end

     0   :  { %7 = vsyncpa [#allocation3], 0  ;;  %s157_s0 = inlined_call_operand.hbm [shape: f32[2,256], index: 0, kind: input, shape index: {}]   ;;  %s158_s1 = inlined_call_operand.vmem [shape: f32[1,256], index: 1, kind: input, shape index: {}]   ;;  %s159_s2 = inlined_call_operand.hbm [shape: f32[2,256], index: 2, kind: output, shape index: {}]  }
   0x1   :  { %8 = vsyncpa [#allocation4], 0  ;;  %s112_s9 = smov [#allocation2]   ;;  %s64_s13 = scalar_lea.hbm %s157_s0, 64 }
   0x2   :  { %s15_s10 = sshll.u32 %s112_s9, 4  ;;  %p65_p0 = scmp.ne.s32.totalorder %s157_s0, %s64_s13  ;;  %s16_s10 = int_to_ptr.vmem [resolvable:$true] %s15_s10 }
   0x3   :  { %p68_p1 = scmp.lt.u32.totalorder %s64_s13, %s157_s0 }
   0x5   :  { %p70_p2 = pnand %p68_p1, %p65_p0 }
   0x7   :  { %73 = shalt.err (!%p70_p2)
}
   0x8   :  { %s74_s18 = scalar_lea.vmem %s16_s10, 64  ;;  %p79_p4 = scmp.lt.s32.totalorder %s16_s10, %s16_s10 }
   0x9   :  { %p75_p3 = scmp.ne.s32.totalorder %s16_s10, %s74_s18  ;;  %p80_p5 = scmp.lt.s32.totalorder %s74_s18, %s74_s18 }
   0xb   :  { %p81_p6 = por %p80_p5, %p79_p4 }
   0xd   :  { %p82_p7 = pnand %p81_p6, %p75_p3 }
   0xf   :  { %85 = shalt.err (!%p82_p7)
}
  0x10   :  { %18 = dma.hbm_to_vmem [thread:$0]  %s157_s0, 64, %s16_s10, [#allocation3]  }
  0x11   :  { %108 = dma.done.wait [#allocation3], 64  }
  0x12   :  { %109 = vsyncadd [#allocation3], 4294967232  ;;  %v27_v0 = vlaneseq  ;;  %v113_v1 = vmov 1983009808   ;;  %v25_v7 = vld [vmem:[%s158_s1] sm:$0x3] }
  0x13   :  { %v37_v2 = vunpack.c.l.s4 %v113_v1  ;;  %v24_v12 = vld [vmem:[#allocation2] sm:$0xf]  ;;  %s114_s23 = smov [#allocation5]  }
  0x14   :  { %v28_v3 = vshrl.u32 %v27_v0, 7  ;;  %s52_s0 = sshll.u32 %s114_s23, 4  ;;  %s53_s0 = int_to_ptr.vmem [resolvable:$true] %s52_s0 }
  0x15   :  { %v38_v6 = vunpack.c.0.s8 %v37_v2  ;;  %s86_s24 = scalar_lea.vmem %s53_s0, 64  ;;  %p91_p9 = scmp.lt.s32.totalorder %s53_s0, %s53_s0 }
  0x16   :  { %v29_v4 = vsub.s32 0, %v28_v3  ;;  %v33_v5 = vsub.s32 1, %v28_v3  ;;  %p87_p8 = scmp.ne.s32.totalorder %s53_s0, %s86_s24  ;;  %p92_p10 = scmp.lt.s32.totalorder %s86_s24, %s86_s24 }
  0x17   :  { %v41_v10 = vsub.s32 %v38_v6, %v28_v3 }
  0x18   :  { %v30_v8 = vrot.slane %v25_v7, %v29_v4  ;;  %v34_v9 = vrot.slane %v25_v7, %v33_v5  ;;  %p93_p11 = por %p92_p10, %p91_p9 }
  0x1a   :  { %v35_v11 = vcombine.low %v30_v8, %v34_v9  ;;  %p94_p12 = pnand %p93_p11, %p87_p8 }
  0x1c   :  { %v42_v13 = vrot.slane %v35_v11, %v41_v10 }
  0x1e   :  { %v44_v14 = vadd.f32 %v42_v13, %v24_v12 }
  0x20   :  { %45 = vst [vmem:[#allocation5] sm:$0xf] %v44_v14 }
  0x21   :  { %97 = shalt.err (!%p94_p12)
}
  0x22   :  { %s98_s26 = scalar_lea.hbm %s159_s2, 64 }
  0x23   :  { %p99_p13 = scmp.ne.s32.totalorder %s159_s2, %s98_s26  ;;  %p102_p0 = scmp.lt.u32.totalorder %s98_s26, %s159_s2 }
  0x25   :  { %p104_p1 = pnand %p102_p0, %p99_p13 }
  0x27   :  { %107 = shalt.err (!%p104_p1)
}
  0x28   :  { %55 = dma.vmem_to_hbm [thread:$0]  %s53_s0, 64, %s159_s2, [#allocation4]  }
  0x29   :  { %110 = dma.done.wait [#allocation4], 64  }
  0x2a   :  { %111 = vsyncadd [#allocation4], 4294967232 }
  0x2b   :  { %59 = vsyncpa [#allocation3], 1 }
  0x2c   :  { %60 = vsyncpa [#allocation4], 1 }

</bundles_post_ra>
